<compile_context>
chip_gen: v6e
topology: v6e:2x2x1
jax: 0.10.0
libtpu: 0.0.40
codegen_flags: <defaults>
</compile_context>

<pallas_src>
import functools
import math

import jax
import jax.numpy as jnp
import numpy as np
from jax import lax
from jax.experimental import pallas as pl
from jax.experimental.pallas import tpu as pltpu
from jax.scipy.linalg import block_diag

LOG_STD_MAX = 2.0
LOG_STD_MIN = -20.0
_LN2 = math.log(2.0)
_LOG_2PI = math.log(2.0 * math.pi)

_NUM_W_BLOCKS = 8   # fused 256-lane weight blocks in the packed slab
_NUM_B_ROWS = 8     # bias rows appended after the weight blocks


def _round_up(x, m):
    return ((x + m - 1) // m) * m


def _softplus(x):
    # numerically stable softplus(x) = max(x, 0) + log1p(exp(-|x|))
    return jnp.maximum(x, 0.0) + jnp.log1p(jnp.exp(-jnp.abs(x)))


# --------------------------------------------------------------------------
# Kernel
# --------------------------------------------------------------------------
def _actor_kernel(x_ref, w_ref, out_ref, *, L, act_dim, eh1, e_tot,
                  act_limit, reg_const):
    # x_ref:   [TB, L]        lanes [0, act_dim)           : rsample noise
    #                         lanes [act_dim, act_dim+obs) : obs core + one-hot
    # w_ref:   [8*L + 8, 2L]  packed weight slab (8 fused blocks + bias rows)
    # out_ref: [TB, L]        lanes [0, act_dim): pi, lane act_dim: logp,
    #                         lane act_dim+1: reg
    x = x_ref[...]

    def Wfull(k):                     # [L, 2L] fused block (two RHS, one LHS)
        return w_ref[k * L:(k + 1) * L, :]

    def Whalf(k):                     # [L, L] single-RHS block
        return w_ref[k * L:(k + 1) * L, :L]

    brow = w_ref[_NUM_W_BLOCKS * L:_NUM_W_BLOCKS * L + _NUM_B_ROWS, :]  # [8, 2L]

    def b(k):
        return brow[k:k + 1, :L]      # [1, L], broadcasts over batch rows

    def bhi(k):
        return brow[k:k + 1, L:]

    def mm(a, w):
        return jnp.dot(a, w, preferred_element_type=jnp.float32)

    relu = lambda z: jnp.maximum(z, 0.0)

    # Backbone layer 1 fused with the task-query lookup (one-hot @ tiled tq).
    # Noise lanes hit all-zero weight rows, so they do not pollute either half.
    zA = mm(x, Wfull(0))                       # [TB, 2L]
    h = relu(zA[:, :L] + b(0))
    qt = zA[:, L:]                             # task query tiled E times
    h = relu(mm(h, Whalf(1)) + b(1))           # backbone layer 2

    # Experts fused: layer-1 concatenated, layer-2 block-diagonal.
    ehid = relu(mm(h, Whalf(2)) + b(2))        # [TB, L] expert hidden, E blocks
    eo = mm(ehid, Whalf(3)) + b(3)             # expert outputs (Identity head)

    # Keys | values in one 256-lane matmul (shared LHS, block-diag per expert).
    zkv = mm(eo, Wfull(4))
    kk = zkv[:, :L]
    vv = zkv[:, L:]

    # Attention scores: <key_e, query>, replicated across each expert block.
    s = mm(kk * qt, Whalf(5))                  # [TB, L], score_e repeated eh1x
    m = jnp.max(s, axis=-1, keepdims=True)
    ex = jnp.exp(s - m)
    if e_tot < L:                              # mask pad lanes (no-op if L == E*eh1)
        lane_e = lax.broadcasted_iota(jnp.int32, ex.shape, 1)
        ex = jnp.where(lane_e < e_tot, ex, 0.0)
    denom = jnp.sum(ex, axis=-1, keepdims=True)        # = eh1 * sum_e exp(.)
    attn_lane = ex * (float(eh1) / denom)              # w_e replicated per block

    # Tower = sum_e w_e * v_e, folded into the (tiled) head hidden weights;
    # mu and log_std heads fused into one 256-lane matmul.
    hml = relu(mm(attn_lane * vv, Whalf(6)) + b(4))    # [TB, L]  mu|log_std hidden
    zh = mm(hml, Wfull(7))
    mu = zh[:, :L] + b(5)                              # lanes 0..act_dim-1, else 0
    log_std = jnp.clip(zh[:, L:] + bhi(5), LOG_STD_MIN, LOG_STD_MAX)
    std = jnp.exp(log_std)                             # pad lanes -> exp(0) = 1

    lane = lax.broadcasted_iota(jnp.int32, x.shape, 1)
    nz = jnp.where(lane < act_dim, x, 0.0)             # noise lives in lanes [0, act_dim)
    a = mu + std * nz                                  # pad lanes -> 0
    pi = act_limit * jnp.tanh(a)                       # pad lanes -> 0

    # (a - mu)^2 / (2 std^2) == 0.5 * noise^2 exactly.
    logp_elem = -0.5 * nz * nz - log_std - 0.5 * _LOG_2PI
    corr = 2.0 * (_LN2 - a - _softplus(-2.0 * a))
    contrib = jnp.where(lane < act_dim, logp_elem - corr, 0.0)
    logp = jnp.sum(contrib, axis=-1, keepdims=True)    # [TB, 1]

    out = (pi
           + jnp.where(lane == act_dim, logp, 0.0)
           + jnp.where(lane == act_dim + 1, reg_const, 0.0))
    out_ref[...] = out


# --------------------------------------------------------------------------
# Parameter packing (do once, not per call)
# --------------------------------------------------------------------------
def pack_actor_params(params, *, obs_feat, num_tasks, num_experts, act_dim):
    E = num_experts
    f32 = jnp.float32
    bw1 = jnp.asarray(params["bw1"], f32)
    bw2 = jnp.asarray(params["bw2"], f32)
    ew1 = jnp.asarray(params["ew1"], f32)
    ew2 = jnp.asarray(params["ew2"], f32)
    kmat = jnp.asarray(params["kmat"], f32)
    vmat = jnp.asarray(params["vmat"], f32)
    mw1 = jnp.asarray(params["mw1"], f32)
    mw2 = jnp.asarray(params["mw2"], f32)
    lw1 = jnp.asarray(params["lw1"], f32)
    lw2 = jnp.asarray(params["lw2"], f32)
    tq = jnp.asarray(params["tq"], f32)

    bh0 = bw1.shape[1]
    bh1 = bw2.shape[1]
    eh0 = ew1.shape[2]
    eh1 = ew2.shape[2]
    obs_full = obs_feat + num_tasks
    assert bw1.shape[0] == obs_feat
    assert tq.shape == (num_tasks, eh1), "task-query dim must equal eh[-1]"

    L = _round_up(max(act_dim + obs_full, bh0, bh1, E * eh0, E * eh1,
                      2 * bh0, act_dim + 2), 128)
    WL = 2 * L
    zeros_blk = jnp.zeros((L, WL), f32)

    # Block 0: backbone layer-1 (rows offset by act_dim so noise lanes hit
    # zero rows), fused with the task-query lookup in lanes [L, 2L):
    # one-hot rows map directly to the E-times-tiled task query.
    tq_tiled = jnp.tile(tq, (1, E))                                   # [T, E*eh1]
    blk0 = (zeros_blk
            .at[act_dim:act_dim + obs_feat, 0:bh0].set(bw1)
            .at[act_dim + obs_feat:act_dim + obs_full, L:L + E * eh1]
            .set(tq_tiled))
    blk1 = zeros_blk.at[0:bh0, 0:bh1].set(bw2)

    ew1f = jnp.concatenate([ew1[e] for e in range(E)], axis=1)        # [bh1, E*eh0]
    blk2 = zeros_blk.at[0:bh1, 0:E * eh0].set(ew1f)
    ew2bd = block_diag(*[ew2[e] for e in range(E)])                   # [E*eh0, E*eh1]
    blk3 = zeros_blk.at[0:E * eh0, 0:E * eh1].set(ew2bd)

    kbd = block_diag(*[kmat[e] for e in range(E)])                    # [E*eh1, E*eh1]
    vbd = block_diag(*[vmat[e] for e in range(E)])
    blk4 = (zeros_blk
            .at[0:E * eh1, 0:E * eh1].set(kbd)
            .at[0:E * eh1, L:L + E * eh1].set(vbd))

    srep = block_diag(*([jnp.ones((eh1, eh1), f32)] * E))             # score reducer
    blk5 = zeros_blk.at[0:E * eh1, 0:E * eh1].set(srep)

    hw1t = jnp.tile(jnp.concatenate([mw1, lw1], axis=1), (E, 1))      # [E*eh1, 2*bh0]
    blk6 = zeros_blk.at[0:E * eh1, 0:2 * bh0].set(hw1t)

    blk7 = (zeros_blk
            .at[0:bh0, 0:act_dim].set(mw2)                            # mu head
            .at[bh0:2 * bh0, L:L + act_dim].set(lw2))                 # log_std head

    eb1f = jnp.concatenate([jnp.asarray(params["eb1"][e], f32).reshape(-1)
                            for e in range(E)])
    eb2f = jnp.concatenate([jnp.asarray(params["eb2"][e], f32).reshape(-1)
                            for e in range(E)])
    hb1 = jnp.concatenate([jnp.asarray(params["mb1"], f32).reshape(-1),
                           jnp.asarray(params["lb1"], f32).reshape(-1)])
    bias = (jnp.zeros((_NUM_B_ROWS, WL), f32)
            .at[0, 0:bh0].set(jnp.asarray(params["bb1"], f32).reshape(-1))
            .at[1, 0:bh1].set(jnp.asarray(params["bb2"], f32).reshape(-1))
            .at[2, 0:E * eh0].set(eb1f)
            .at[3, 0:E * eh1].set(eb2f)
            .at[4, 0:2 * bh0].set(hb1)
            .at[5, 0:act_dim].set(jnp.asarray(params["mb2"], f32).reshape(-1))
            .at[5, L:L + act_dim].set(jnp.asarray(params["lb2"], f32).reshape(-1)))

    w_slab = jnp.concatenate([blk0, blk1, blk2, blk3, blk4, blk5, blk6, blk7,
                              bias], axis=0)                          # [8L+8, 2L]
    return {"w": w_slab, "L": L, "obs_feat": obs_feat,
            "num_tasks": num_tasks, "num_experts": E, "eh1": eh1,
            "act_dim": act_dim}


# --------------------------------------------------------------------------
# Forward wrapper
# --------------------------------------------------------------------------
def moe_actor_forward(obs, noise, packed, *, act_limit, mu_coef):
    # TODO(synk): deterministic / with_logprob flags not exposed — the kernel
    # always samples (with externally supplied noise) and returns log-prob.
    w = packed["w"]
    L = packed["L"]
    obs_feat = packed["obs_feat"]
    num_tasks = packed["num_tasks"]
    E = packed["num_experts"]
    eh1 = packed["eh1"]
    act_dim = packed["act_dim"]

    B = obs.shape[0]
    obs = obs.astype(jnp.float32)
    noise = noise.astype(jnp.float32)

    # Re-derive the task one-hot via argmax (matches torch.argmax exactly even
    # if the trailing obs block is not a clean one-hot); the query lookup and
    # E-fold tiling then happen inside the kernel's first fused matmul.
    task_oh = jax.nn.one_hot(jnp.argmax(obs[:, obs_feat:], axis=-1),
                             num_tasks, dtype=jnp.float32)

    # Single lane-dense input plane: noise in lanes [0, act_dim), obs core +
    # one-hot in lanes [act_dim, act_dim + obs_feat + num_tasks).
    x = jnp.concatenate([noise, obs[:, :obs_feat], task_oh], axis=1)
    x = jnp.pad(x, ((0, 0), (0, L - x.shape[1])))

    # Batch tile: as large as possible (amortize per-step pipeline overhead),
    # but keep >=2 grid steps when the batch allows so both v7x TensorCores
    # get work via the "parallel" grid axis.
    TB = min(1024, _round_up(B, 8))
    if TB >= 16 and _round_up(B, TB) // TB < 2:
        TB = _round_up(TB // 2, 8)
    Bp = _round_up(B, TB)
    if Bp != B:
        x = jnp.pad(x, ((0, Bp - B), (0, 0)))

    R, WL = w.shape
    # Softmax weights sum to exactly 1 -> reg is a data-independent constant.
    reg_const = -(1.0 / E) * float(mu_coef) * (1.0 + E * 1e-6)
    kernel = functools.partial(
        _actor_kernel, L=L, act_dim=act_dim, eh1=eh1, e_tot=E * eh1,
        act_limit=float(act_limit), reg_const=reg_const)

    out = pl.pallas_call(
        kernel,
        out_shape=jax.ShapeDtypeStruct((Bp, L), jnp.float32),
        grid=(Bp // TB,),
        in_specs=[pl.BlockSpec((TB, L), lambda i: (i, 0)),
                  pl.BlockSpec((R, WL), lambda i: (0, 0))],   # weights VMEM-resident
        out_specs=pl.BlockSpec((TB, L), lambda i: (i, 0)),
        compiler_params=pltpu.CompilerParams(
            dimension_semantics=("parallel",),
            vmem_limit_bytes=32 * 1024 * 1024),   # covers v5e's 16 MiB default
    )(x, w)

    pi = out[:B, :act_dim]
    logp = out[:B, act_dim]
    reg = out[:B, act_dim + 1]
    return pi, logp, reg


# --------------------------------------------------------------------------
# Init + pure-JAX reference (unchanged semantics)
# --------------------------------------------------------------------------
def init_params(key, obs_feat, backbone_hidden, expert_hidden,
                num_experts, num_tasks, act_dim):
    keys = iter(jax.random.split(key, 32))

    def lin(fan_in, fan_out):
        s = 1.0 / math.sqrt(fan_in)
        w = jax.random.normal(next(keys), (fan_in, fan_out), jnp.float32) * s
        b = jax.random.normal(next(keys), (1, fan_out), jnp.float32) * s
        return w, b

    p = {}
    bh0, bh1 = backbone_hidden
    eh0, eh1 = expert_hidden
    p["bw1"], p["bb1"] = lin(obs_feat, bh0)
    p["bw2"], p["bb2"] = lin(bh0, bh1)

    s1 = 1.0 / math.sqrt(bh1)
    s2 = 1.0 / math.sqrt(eh0)
    p["ew1"] = jax.random.normal(next(keys), (num_experts, bh1, eh0), jnp.float32) * s1
    p["eb1"] = jax.random.normal(next(keys), (num_experts, 1, eh0), jnp.float32) * s1
    p["ew2"] = jax.random.normal(next(keys), (num_experts, eh0, eh1), jnp.float32) * s2
    p["eb2"] = jax.random.normal(next(keys), (num_experts, 1, eh1), jnp.float32) * s2

    dq = eh1
    p["kmat"] = (jax.random.normal(next(keys), (num_experts, dq, eh1), jnp.float32)
                 / math.sqrt(dq))
    p["vmat"] = (jax.random.normal(next(keys), (num_experts, dq, eh1), jnp.float32)
                 / math.sqrt(dq))
    p["tq"] = jax.random.normal(next(keys), (num_tasks, dq), jnp.float32)

    p["mw1"], p["mb1"] = lin(eh1, bh0)
    p["mw2"], p["mb2"] = lin(bh0, act_dim)
    p["lw1"], p["lb1"] = lin(eh1, bh0)
    p["lw2"], p["lb2"] = lin(bh0, act_dim)
    return p


def reference_forward(obs, noise, p, *, num_tasks, num_experts,
                      act_limit, mu_coef):
    """Pure-JAX mirror of the PyTorch forward (for correctness check)."""
    obs_feat = obs.shape[1] - num_tasks
    o = obs[:, :obs_feat]
    task = jnp.argmax(obs[:, obs_feat:], axis=-1)
    relu = lambda x: jnp.maximum(x, 0.0)

    h = relu(o @ p["bw1"] + p["bb1"])
    bb = relu(h @ p["bw2"] + p["bb2"])

    eo = jnp.stack(
        [relu(bb @ p["ew1"][l] + p["eb1"][l]) @ p["ew2"][l] + p["eb2"][l]
         for l in range(num_experts)], axis=1)                       # [B, E, D]
    keys = jnp.einsum("kli,lij->klj", eo, p["kmat"])
    vals = jnp.einsum("kli,lij->klj", eo, p["vmat"])
    q = p["tq"][task]
    scores = jnp.einsum("kni,ki->kn", keys, q)
    w = jax.nn.softmax(scores, axis=-1)
    tower = jnp.einsum("kn,kni->ki", w, vals)
    reg = -(1.0 / num_experts) * mu_coef * jnp.sum(w + 1e-6, axis=-1)

    mu = relu(tower @ p["mw1"] + p["mb1"]) @ p["mw2"] + p["mb2"]
    log_std = relu(tower @ p["lw1"] + p["lb1"]) @ p["lw2"] + p["lb2"]
    log_std = jnp.clip(log_std, LOG_STD_MIN, LOG_STD_MAX)
    std = jnp.exp(log_std)
    a = mu + std * noise

    logp = jnp.sum(-((a - mu) ** 2) / (2.0 * std * std) - log_std
                   - 0.5 * math.log(2.0 * math.pi), axis=-1)
    logp = logp - jnp.sum(2.0 * (math.log(2.0) - a - jax.nn.softplus(-2.0 * a)),
                          axis=1)
    pi = act_limit * jnp.tanh(a)
    return pi, logp, reg


if __name__ == "__main__":
    B = 8
    num_tasks = 4
    obs_feat = 12                      # obs_dim (full) = 16, minus num_tasks
    backbone_hidden = (32, 32)
    expert_hidden = (32, 32)
    num_experts = 4
    act_dim = 6
    act_limit = 2.0
    mu_coef = 0.01

    key = jax.random.PRNGKey(0)
    k_obs, k_task, k_noise, k_params = jax.random.split(key, 4)

    obs_core = jax.random.normal(k_obs, (B, obs_feat), jnp.float32)
    task_ids = jax.random.randint(k_task, (B,), 0, num_tasks)
    one_hot = jax.nn.one_hot(task_ids, num_tasks, dtype=jnp.float32)
    obs = jnp.concatenate([obs_core, one_hot], axis=-1)              # [B, 16]
    noise = jax.random.normal(k_noise, (B, act_dim), jnp.float32)    # rsample noise

    params = init_params(k_params, obs_feat, backbone_hidden, expert_hidden,
                         num_experts, num_tasks, act_dim)

    packed = pack_actor_params(params, obs_feat=obs_feat, num_tasks=num_tasks,
                               num_experts=num_experts, act_dim=act_dim)

    pi, logp, reg = moe_actor_forward(
        obs, noise, packed, act_limit=act_limit, mu_coef=mu_coef)
    jax.block_until_ready((pi, logp, reg))

    pi_r, logp_r, reg_r = reference_forward(
        obs, noise, params, num_tasks=num_tasks, num_experts=num_experts,
        act_limit=act_limit, mu_coef=mu_coef)

    np.testing.assert_allclose(np.asarray(pi), np.asarray(pi_r), rtol=1e-4, atol=1e-4)
    np.testing.assert_allclose(np.asarray(logp), np.asarray(logp_r), rtol=1e-3, atol=1e-3)
    np.testing.assert_allclose(np.asarray(reg), np.asarray(reg_r), rtol=1e-5, atol=1e-6)

    print("KERNEL_OK")
</pallas_src>

<mosaic_0001>
module attributes {stable_mosaic.version = 11 : i64} {
  func.func @_actor_kernel(%arg0: i32, %arg1: memref<8x128xf32, #tpu.memory_space<vmem>>, %arg2: memref<1032x256xf32, #tpu.memory_space<vmem>>, %arg3: memref<8x128xf32, #tpu.memory_space<vmem>>) attributes {dimension_semantics = [#tpu.dimension_semantics<parallel>], iteration_bounds = array<i64: 1>, scalar_prefetch = 0 : i64, scratch_operands = 0 : i64, tpu.core_type = #tpu.core_type<tc>, window_params = [{transform_indices = @transform_0, window_bounds = array<i64: 8, 128>}, {pipeline_mode = #tpu.pipeline_mode<synchronous>, transform_indices = @transform_1, window_bounds = array<i64: 1032, 256>}, {transform_indices = @transform_2, window_bounds = array<i64: 8, 128>}]} {
    %c0 = arith.constant 0 : index
    %c0_0 = arith.constant 0 : index
    %0 = vector.load %arg1[%c0, %c0_0] : memref<8x128xf32, #tpu.memory_space<vmem>>, vector<8x128xf32>
    %c1024 = arith.constant 1024 : index
    %c0_1 = arith.constant 0 : index
    %1 = vector.load %arg2[%c1024, %c0_1] : memref<1032x256xf32, #tpu.memory_space<vmem>>, vector<8x256xf32>
    %c0_2 = arith.constant 0 : index
    %c0_3 = arith.constant 0 : index
    %2 = vector.load %arg2[%c0_2, %c0_3] : memref<1032x256xf32, #tpu.memory_space<vmem>>, vector<128x256xf32>
    %cst = arith.constant dense<0.000000e+00> : vector<8x256xf32>
    %3 = tpu.matmul %0, %2, %cst {dimension_numbers = #tpu.dot_dimension_numbers<[1], [0], [0], [1], [0, 0, 1, 1], [], []>} : vector<8x128xf32>, vector<128x256xf32>, vector<8x256xf32> -> vector<8x256xf32>
    %4 = vector.extract_strided_slice %3 {offsets = [0, 0], sizes = [8, 128], strides = [1, 1]} : vector<8x256xf32> to vector<8x128xf32>
    %5 = vector.extract_strided_slice %1 {offsets = [0, 0], sizes = [1, 128], strides = [1, 1]} : vector<8x256xf32> to vector<1x128xf32>
    %6 = vector.broadcast %5 : vector<1x128xf32> to vector<8x128xf32>
    %7 = arith.addf %4, %6 : vector<8x128xf32>
    %cst_4 = arith.constant 0.000000e+00 : f32
    %8 = vector.broadcast %cst_4 : f32 to vector<8x128xf32>
    %9 = arith.maximumf %7, %8 : vector<8x128xf32>
    %10 = vector.extract_strided_slice %3 {offsets = [0, 128], sizes = [8, 128], strides = [1, 1]} : vector<8x256xf32> to vector<8x128xf32>
    %c128 = arith.constant 128 : index
    %c0_5 = arith.constant 0 : index
    %11 = vector.load %arg2[%c128, %c0_5] : memref<1032x256xf32, #tpu.memory_space<vmem>>, vector<128x128xf32>
    %cst_6 = arith.constant dense<0.000000e+00> : vector<8x128xf32>
    %12 = tpu.matmul %9, %11, %cst_6 {dimension_numbers = #tpu.dot_dimension_numbers<[1], [0], [0], [1], [0, 0, 1, 1], [], []>} : vector<8x128xf32>, vector<128x128xf32>, vector<8x128xf32> -> vector<8x128xf32>
    %13 = vector.extract_strided_slice %1 {offsets = [1, 0], sizes = [1, 128], strides = [1, 1]} : vector<8x256xf32> to vector<1x128xf32>
    %14 = vector.broadcast %13 : vector<1x128xf32> to vector<8x128xf32>
    %15 = arith.addf %12, %14 : vector<8x128xf32>
    %cst_7 = arith.constant 0.000000e+00 : f32
    %16 = vector.broadcast %cst_7 : f32 to vector<8x128xf32>
    %17 = arith.maximumf %15, %16 : vector<8x128xf32>
    %c256 = arith.constant 256 : index
    %c0_8 = arith.constant 0 : index
    %18 = vector.load %arg2[%c256, %c0_8] : memref<1032x256xf32, #tpu.memory_space<vmem>>, vector<128x128xf32>
    %cst_9 = arith.constant dense<0.000000e+00> : vector<8x128xf32>
    %19 = tpu.matmul %17, %18, %cst_9 {dimension_numbers = #tpu.dot_dimension_numbers<[1], [0], [0], [1], [0, 0, 1, 1], [], []>} : vector<8x128xf32>, vector<128x128xf32>, vector<8x128xf32> -> vector<8x128xf32>
    %20 = vector.extract_strided_slice %1 {offsets = [2, 0], sizes = [1, 128], strides = [1, 1]} : vector<8x256xf32> to vector<1x128xf32>
    %21 = vector.broadcast %20 : vector<1x128xf32> to vector<8x128xf32>
    %22 = arith.addf %19, %21 : vector<8x128xf32>
    %cst_10 = arith.constant 0.000000e+00 : f32
    %23 = vector.broadcast %cst_10 : f32 to vector<8x128xf32>
    %24 = arith.maximumf %22, %23 : vector<8x128xf32>
    %c384 = arith.constant 384 : index
    %c0_11 = arith.constant 0 : index
    %25 = vector.load %arg2[%c384, %c0_11] : memref<1032x256xf32, #tpu.memory_space<vmem>>, vector<128x128xf32>
    %cst_12 = arith.constant dense<0.000000e+00> : vector<8x128xf32>
    %26 = tpu.matmul %24, %25, %cst_12 {dimension_numbers = #tpu.dot_dimension_numbers<[1], [0], [0], [1], [0, 0, 1, 1], [], []>} : vector<8x128xf32>, vector<128x128xf32>, vector<8x128xf32> -> vector<8x128xf32>
    %27 = vector.extract_strided_slice %1 {offsets = [3, 0], sizes = [1, 128], strides = [1, 1]} : vector<8x256xf32> to vector<1x128xf32>
    %28 = vector.broadcast %27 : vector<1x128xf32> to vector<8x128xf32>
    %29 = arith.addf %26, %28 : vector<8x128xf32>
    %c512 = arith.constant 512 : index
    %c0_13 = arith.constant 0 : index
    %30 = vector.load %arg2[%c512, %c0_13] : memref<1032x256xf32, #tpu.memory_space<vmem>>, vector<128x256xf32>
    %cst_14 = arith.constant dense<0.000000e+00> : vector<8x256xf32>
    %31 = tpu.matmul %29, %30, %cst_14 {dimension_numbers = #tpu.dot_dimension_numbers<[1], [0], [0], [1], [0, 0, 1, 1], [], []>} : vector<8x128xf32>, vector<128x256xf32>, vector<8x256xf32> -> vector<8x256xf32>
    %32 = vector.extract_strided_slice %31 {offsets = [0, 0], sizes = [8, 128], strides = [1, 1]} : vector<8x256xf32> to vector<8x128xf32>
    %33 = vector.extract_strided_slice %31 {offsets = [0, 128], sizes = [8, 128], strides = [1, 1]} : vector<8x256xf32> to vector<8x128xf32>
    %34 = arith.mulf %32, %10 : vector<8x128xf32>
    %c640 = arith.constant 640 : index
    %c0_15 = arith.constant 0 : index
    %35 = vector.load %arg2[%c640, %c0_15] : memref<1032x256xf32, #tpu.memory_space<vmem>>, vector<128x128xf32>
    %cst_16 = arith.constant dense<0.000000e+00> : vector<8x128xf32>
    %36 = tpu.matmul %34, %35, %cst_16 {dimension_numbers = #tpu.dot_dimension_numbers<[1], [0], [0], [1], [0, 0, 1, 1], [], []>} : vector<8x128xf32>, vector<128x128xf32>, vector<8x128xf32> -> vector<8x128xf32>
    %cst_17 = arith.constant dense<0xFF800000> : vector<8xf32>
    %37 = vector.multi_reduction <maximumf>, %36, %cst_17 [1] : vector<8x128xf32> to vector<8xf32>
    %38 = vector.shape_cast %37 : vector<8xf32> to vector<8x1xf32>
    %39 = vector.broadcast %38 : vector<8x1xf32> to vector<8x128xf32>
    %40 = arith.subf %36, %39 : vector<8x128xf32>
    %41 = math.exp %40 : vector<8x128xf32>
    %cst_18 = arith.constant dense<0.000000e+00> : vector<8xf32>
    %42 = vector.multi_reduction <add>, %41, %cst_18 [1] : vector<8x128xf32> to vector<8xf32>
    %43 = vector.shape_cast %42 : vector<8xf32> to vector<8x1xf32>
    %cst_19 = arith.constant 3.200000e+01 : f32
    %44 = vector.broadcast %cst_19 : f32 to vector<8x1xf32>
    %45 = arith.divf %44, %43 : vector<8x1xf32>
    %46 = vector.broadcast %45 : vector<8x1xf32> to vector<8x128xf32>
    %47 = arith.mulf %41, %46 : vector<8x128xf32>
    %48 = arith.mulf %47, %33 : vector<8x128xf32>
    %c768 = arith.constant 768 : index
    %c0_20 = arith.constant 0 : index
    %49 = vector.load %arg2[%c768, %c0_20] : memref<1032x256xf32, #tpu.memory_space<vmem>>, vector<128x128xf32>
    %cst_21 = arith.constant dense<0.000000e+00> : vector<8x128xf32>
    %50 = tpu.matmul %48, %49, %cst_21 {dimension_numbers = #tpu.dot_dimension_numbers<[1], [0], [0], [1], [0, 0, 1, 1], [], []>} : vector<8x128xf32>, vector<128x128xf32>, vector<8x128xf32> -> vector<8x128xf32>
    %51 = vector.extract_strided_slice %1 {offsets = [4, 0], sizes = [1, 128], strides = [1, 1]} : vector<8x256xf32> to vector<1x128xf32>
    %52 = vector.broadcast %51 : vector<1x128xf32> to vector<8x128xf32>
    %53 = arith.addf %50, %52 : vector<8x128xf32>
    %cst_22 = arith.constant 0.000000e+00 : f32
    %54 = vector.broadcast %cst_22 : f32 to vector<8x128xf32>
    %55 = arith.maximumf %53, %54 : vector<8x128xf32>
    %c896 = arith.constant 896 : index
    %c0_23 = arith.constant 0 : index
    %56 = vector.load %arg2[%c896, %c0_23] : memref<1032x256xf32, #tpu.memory_space<vmem>>, vector<128x256xf32>
    %cst_24 = arith.constant dense<0.000000e+00> : vector<8x256xf32>
    %57 = tpu.matmul %55, %56, %cst_24 {dimension_numbers = #tpu.dot_dimension_numbers<[1], [0], [0], [1], [0, 0, 1, 1], [], []>} : vector<8x128xf32>, vector<128x256xf32>, vector<8x256xf32> -> vector<8x256xf32>
    %58 = vector.extract_strided_slice %57 {offsets = [0, 0], sizes = [8, 128], strides = [1, 1]} : vector<8x256xf32> to vector<8x128xf32>
    %59 = vector.extract_strided_slice %1 {offsets = [5, 0], sizes = [1, 128], strides = [1, 1]} : vector<8x256xf32> to vector<1x128xf32>
    %60 = vector.broadcast %59 : vector<1x128xf32> to vector<8x128xf32>
    %61 = arith.addf %58, %60 : vector<8x128xf32>
    %62 = vector.extract_strided_slice %57 {offsets = [0, 128], sizes = [8, 128], strides = [1, 1]} : vector<8x256xf32> to vector<8x128xf32>
    %63 = vector.extract_strided_slice %1 {offsets = [5, 128], sizes = [1, 128], strides = [1, 1]} : vector<8x256xf32> to vector<1x128xf32>
    %64 = vector.broadcast %63 : vector<1x128xf32> to vector<8x128xf32>
    %65 = arith.addf %62, %64 : vector<8x128xf32>
    %cst_25 = arith.constant -2.000000e+01 : f32
    %cst_26 = arith.constant 2.000000e+00 : f32
    %66 = vector.broadcast %cst_25 : f32 to vector<8x128xf32>
    %67 = arith.maximumf %66, %65 : vector<8x128xf32>
    %68 = vector.broadcast %cst_26 : f32 to vector<8x128xf32>
    %69 = arith.minimumf %68, %67 : vector<8x128xf32>
    %70 = math.exp %69 : vector<8x128xf32>
    %71 = tpu.iota {dimensions = array<i32: 1>} : vector<8x128xi32>
    %c6_i32 = arith.constant 6 : i32
    %72 = vector.broadcast %c6_i32 : i32 to vector<8x128xi32>
    %73 = arith.cmpi slt, %71, %72 : vector<8x128xi32>
    %cst_27 = arith.constant 0.000000e+00 : f32
    %74 = vector.broadcast %cst_27 : f32 to vector<8x128xf32>
    %75 = arith.select %73, %0, %74 : vector<8x128xi1>, vector<8x128xf32>
    %76 = arith.mulf %70, %75 : vector<8x128xf32>
    %77 = arith.addf %61, %76 : vector<8x128xf32>
    %78 = math.tanh %77 : vector<8x128xf32>
    %cst_28 = arith.constant 2.000000e+00 : f32
    %79 = vector.broadcast %cst_28 : f32 to vector<8x128xf32>
    %80 = arith.mulf %79, %78 : vector<8x128xf32>
    %cst_29 = arith.constant -5.000000e-01 : f32
    %81 = vector.broadcast %cst_29 : f32 to vector<8x128xf32>
    %82 = arith.mulf %81, %75 : vector<8x128xf32>
    %83 = arith.mulf %82, %75 : vector<8x128xf32>
    %84 = arith.subf %83, %69 : vector<8x128xf32>
    %cst_30 = arith.constant 0.918938517 : f32
    %85 = vector.broadcast %cst_30 : f32 to vector<8x128xf32>
    %86 = arith.subf %84, %85 : vector<8x128xf32>
    %cst_31 = arith.constant 0.693147182 : f32
    %87 = vector.broadcast %cst_31 : f32 to vector<8x128xf32>
    %88 = arith.subf %87, %77 : vector<8x128xf32>
    %cst_32 = arith.constant -2.000000e+00 : f32
    %89 = vector.broadcast %cst_32 : f32 to vector<8x128xf32>
    %90 = arith.mulf %89, %77 : vector<8x128xf32>
    %cst_33 = arith.constant 0.000000e+00 : f32
    %91 = vector.broadcast %cst_33 : f32 to vector<8x128xf32>
    %92 = arith.maximumf %90, %91 : vector<8x128xf32>
    %93 = math.absf %90 : vector<8x128xf32>
    %cst_34 = arith.constant 0.000000e+00 : f32
    %94 = vector.broadcast %cst_34 : f32 to vector<8x128xf32>
    %95 = arith.subf %94, %93 : vector<8x128xf32>
    %96 = math.exp %95 : vector<8x128xf32>
    %97 = math.log1p %96 : vector<8x128xf32>
    %98 = arith.addf %92, %97 : vector<8x128xf32>
    %99 = arith.subf %88, %98 : vector<8x128xf32>
    %cst_35 = arith.constant 2.000000e+00 : f32
    %100 = vector.broadcast %cst_35 : f32 to vector<8x128xf32>
    %101 = arith.mulf %100, %99 : vector<8x128xf32>
    %c6_i32_36 = arith.constant 6 : i32
    %102 = vector.broadcast %c6_i32_36 : i32 to vector<8x128xi32>
    %103 = arith.cmpi slt, %71, %102 : vector<8x128xi32>
    %104 = arith.subf %86, %101 : vector<8x128xf32>
    %cst_37 = arith.constant 0.000000e+00 : f32
    %105 = vector.broadcast %cst_37 : f32 to vector<8x128xf32>
    %106 = arith.select %103, %104, %105 : vector<8x128xi1>, vector<8x128xf32>
    %cst_38 = arith.constant dense<0.000000e+00> : vector<8xf32>
    %107 = vector.multi_reduction <add>, %106, %cst_38 [1] : vector<8x128xf32> to vector<8xf32>
    %108 = vector.shape_cast %107 : vector<8xf32> to vector<8x1xf32>
    %c6_i32_39 = arith.constant 6 : i32
    %109 = vector.broadcast %c6_i32_39 : i32 to vector<8x128xi32>
    %110 = arith.cmpi eq, %71, %109 : vector<8x128xi32>
    %cst_40 = arith.constant 0.000000e+00 : f32
    %111 = vector.shape_cast %108 : vector<8x1xf32> to vector<8x1xf32>
    %112 = vector.broadcast %111 : vector<8x1xf32> to vector<8x128xf32>
    %113 = vector.broadcast %cst_40 : f32 to vector<8x128xf32>
    %114 = arith.select %110, %112, %113 : vector<8x128xi1>, vector<8x128xf32>
    %115 = arith.addf %80, %114 : vector<8x128xf32>
    %c7_i32 = arith.constant 7 : i32
    %116 = vector.broadcast %c7_i32 : i32 to vector<8x128xi32>
    %117 = arith.cmpi eq, %71, %116 : vector<8x128xi32>
    %cst_41 = arith.constant -2.500010e-03 : f32
    %cst_42 = arith.constant 0.000000e+00 : f32
    %118 = vector.broadcast %cst_41 : f32 to vector<8x128xf32>
    %119 = vector.broadcast %cst_42 : f32 to vector<8x128xf32>
    %120 = arith.select %117, %118, %119 : vector<8x128xi1>, vector<8x128xf32>
    %121 = arith.addf %115, %120 : vector<8x128xf32>
    %c0_43 = arith.constant 0 : index
    %c0_44 = arith.constant 0 : index
    %122 = vector.load %arg3[%c0_43, %c0_44] : memref<8x128xf32, #tpu.memory_space<vmem>>, vector<8x128xf32>
    tpu.vector_store %arg3[%c0_43, %c0_44], %121 {strides = array<i32>} : memref<8x128xf32, #tpu.memory_space<vmem>>, vector<8x128xf32>,
    return
  }
  func.func @transform_0(%arg0: i32) -> (i32, i32) {
    %c0_i32 = arith.constant 0 : i32
    %c0_i32_0 = arith.constant 0 : i32
    return %arg0, %c0_i32 : i32, i32
  }
  func.func @transform_1(%arg0: i32) -> (i32, i32) {
    %c0_i32 = arith.constant 0 : i32
    %c0_i32_0 = arith.constant 0 : i32
    %c0_i32_1 = arith.constant 0 : i32
    return %c0_i32, %c0_i32_0 : i32, i32
  }
  func.func @transform_2(%arg0: i32) -> (i32, i32) {
    %c0_i32 = arith.constant 0 : i32
    %c0_i32_0 = arith.constant 0 : i32
    return %arg0, %c0_i32 : i32, i32
  }
}

</mosaic_0001>

<bundles_post_ra>
// kernel: tpu_custom_call.1
= control target key start
LH: loop header
LB: loop body
LE: loop exit
PB: predicated region body
PF: predicated region fallthrough
CT: control target
= control target key end

     0   :  { %7 = vsyncpa [#allocation3], 0  ;;  %s1391_s0 = inlined_call_operand.hbm [shape: f32[8,128], index: 0, kind: input, shape index: {}]   ;;  %s1392_s1 = inlined_call_operand.hbm [shape: f32[1032,256], index: 1, kind: input, shape index: {}]   ;;  %s1393_s2 = inlined_call_operand.hbm [shape: f32[8,128], index: 2, kind: output, shape index: {}]  }
   0x1   :  { %8 = vsyncpa [#allocation6], 0 }
   0x2   :  { %9 = vsyncpa [#allocation4], 0  ;;  %s1235_s9 = smov [#allocation2]   ;;  %s1236_s11 = smov [#allocation5]  }
   0x3   :  { %s16_s10 = sshll.u32 %s1235_s9, 4  ;;  %s25_s12 = sshll.u32 %s1236_s11, 4  ;;  %s17_s10 = int_to_ptr.vmem [resolvable:$true] %s16_s10  ;;  %s26_s12 = int_to_ptr.vmem [resolvable:$true] %s25_s12 }
   0x4   :  { %s1177_s13 = scalar_lea.vmem %s17_s10, 128  ;;  %p1182_p1 = scmp.lt.s32.totalorder %s17_s10, %s17_s10 }
   0x5   :  { %p1178_p0 = scmp.ne.s32.totalorder %s17_s10, %s1177_s13  ;;  %p1183_p2 = scmp.lt.s32.totalorder %s1177_s13, %s1177_s13 }
   0x7   :  { %p1184_p3 = por %p1183_p2, %p1182_p1 }
   0x9   :  { %p1185_p4 = pnand %p1184_p3, %p1178_p0 }
   0xb   :  { %1188 = shalt.err (!%p1185_p4)
}
   0xc   :  { %19 = dma.hbm_to_vmem [thread:$0]  %s1391_s0, 128, %s17_s10, [#allocation3]  }
   0xd   :  { %s1197_s16 = scalar_lea.vmem %s26_s12, 33024  ;;  %p1202_p6 = scmp.lt.s32.totalorder %s26_s12, %s26_s12 }
   0xe   :  { %p1198_p5 = scmp.ne.s32.totalorder %s26_s12, %s1197_s16  ;;  %p1203_p7 = scmp.lt.s32.totalorder %s1197_s16, %s1197_s16 }
  0x10   :  { %p1204_p8 = por %p1203_p7, %p1202_p6 }
  0x12   :  { %p1205_p9 = pnand %p1204_p8, %p1198_p5 }
  0x14   :  { %1208 = shalt.err (!%p1205_p9)
}
  0x15   :  { %s1237_s17 = smov 256   ;;  %s1238_s18 = smov 16  }
  0x16   :  { %31 = dma.hbm_to_vmem [thread:$0]  %s1392_s1, 33024, %s26_s12, [#allocation6], %s1237_s17, %s1237_s17, %s1238_s18  }
  0x17   :  { %1229 = dma.done.wait [#allocation3], 128  }
  0x18   :  { %1230 = vsyncadd [#allocation3], 4294967168 }
  0x19   :  { %1231 = dma.done.wait [#allocation6], 33024  }
  0x1a   :  { %1232 = vsyncadd [#allocation6], 4294934272  ;;  %v1239_v0 = vmov 0.0   ;;  %v72_v1 = vld [vmem:[#allocation5 + $0xf8] sm:$0xff]  ;;  %v71_v2 = vld [vmem:[#allocation5 + $0xf0] sm:$0xff]  ;;  %vm1240_vm0 = vmmov 0   ;;  %v144_v63 = vlaneseq }
  0x1b   :  { %137 = vmatprep.mubr.f32.mxu0 %v1239_v0  ;;  %975 = vmatprep.subr.mxu1 %v1239_v0  ;;  %v70_v3 = vld [vmem:[#allocation5 + $0xe8] sm:$0xff]  ;;  %v69_v4 = vld [vmem:[#allocation5 + $0xe0] sm:$0xff]  ;;  %v68_v5 = vld [vmem:[#allocation5 + $0xd8] sm:$0xff]  ;;  %s1241_s0 = smov [#allocation7]  }
  0x1c   :  { %73 = vmatprep.subr.mxu0 %v72_v1  ;;  %v67_v6 = vld [vmem:[#allocation5 + $0xd0] sm:$0xff]  ;;  %v66_v7 = vld [vmem:[#allocation5 + $0xc8] sm:$0xff]  ;;  %v65_v8 = vld [vmem:[#allocation5 + $0xc0] sm:$0xff]  ;;  %1007 = vmatprep.mubr.msk.f32.mxu1 %vm1240_vm0, %v1239_v0  ;;  %v1303_v1 = vshrl.u32 %v144_v63, 7  ;;  %s879_s1 = sshll.u32 %s1241_s0, 4  ;;  %s880_s1 = int_to_ptr.vmem [resolvable:$true] %s879_s1 }
  0x1d   :  { %74 = vmatpush1.msra.mxu0 %v71_v2  ;;  %v64_v9 = vld [vmem:[#allocation5 + $0xb8] sm:$0xff]  ;;  %v63_v10 = vld [vmem:[#allocation5 + $0xb0] sm:$0xff]  ;;  %v62_v11 = vld [vmem:[#allocation5 + $0xa8] sm:$0xff]  ;;  %s1209_s21 = scalar_lea.vmem %s880_s1, 128  ;;  %p1214_p11 = scmp.lt.s32.totalorder %s880_s1, %s880_s1 }
  0x1e   :  { %75 = vmatprep.subr.mxu0 %v70_v3  ;;  %v61_v12 = vld [vmem:[#allocation5 + $0xa0] sm:$0xff]  ;;  %v60_v13 = vld [vmem:[#allocation5 + $0x98] sm:$0xff]  ;;  %v59_v14 = vld [vmem:[#allocation5 + $0x90] sm:$0xff]  ;;  %v146_v2 = vsub.s32 0, %v1303_v1  ;;  %p1210_p10 = scmp.ne.s32.totalorder %s880_s1, %s1209_s21  ;;  %p1215_p12 = scmp.lt.s32.totalorder %s1209_s21, %s1209_s21 }
  0x1f   :  { %76 = vmatpush1.msra.mxu0 %v69_v4  ;;  %v165_v15 = vld [vmem:[#allocation5 + $0x1f0] sm:$0xff]  ;;  %v164_v16 = vld [vmem:[#allocation5 + $0x1e0] sm:$0xff]  ;;  %v58_v17 = vld [vmem:[#allocation5 + $0x88] sm:$0xff] }
  0x20   :  { %77 = vmatprep.subr.mxu0 %v68_v5  ;;  %976 = vmatpush3.msra.mxu1 %v165_v15  ;;  %v57_v18 = vld [vmem:[#allocation5 + $0x80] sm:$0xff]  ;;  %v163_v19 = vld [vmem:[#allocation5 + $0x1d0] sm:$0xff]  ;;  %v56_v20 = vld [vmem:[#allocation5 + $0x78] sm:$0xff]  ;;  %p1216_p13 = por %p1215_p12, %p1214_p11 }
  0x21   :  { %78 = vmatpush1.msra.mxu0 %v67_v6  ;;  %977 = vmatprep.subr.mxu1 %v1239_v0  ;;  %v55_v21 = vld [vmem:[#allocation5 + $0x70] sm:$0xff]  ;;  %v162_v22 = vld [vmem:[#allocation5 + $0x1c0] sm:$0xff]  ;;  %v54_v23 = vld [vmem:[#allocation5 + $0x68] sm:$0xff] }
  0x22   :  { %79 = vmatprep.subr.mxu0 %v66_v7  ;;  %978 = vmatpush3.msra.mxu1 %v164_v16  ;;  %v53_v24 = vld [vmem:[#allocation5 + $0x60] sm:$0xff]  ;;  %v161_v25 = vld [vmem:[#allocation5 + $0x1b0] sm:$0xff]  ;;  %v52_v26 = vld [vmem:[#allocation5 + $0x58] sm:$0xff]  ;;  %p1217_p0 = pnand %p1216_p13, %p1210_p10 }
  0x23   :  { %80 = vmatpush1.msra.mxu0 %v65_v8  ;;  %979 = vmatprep.subr.mxu1 %v1239_v0  ;;  %v51_v27 = vld [vmem:[#allocation5 + $0x50] sm:$0xff]  ;;  %v160_v28 = vld [vmem:[#allocation5 + $0x1a0] sm:$0xff]  ;;  %v50_v29 = vld [vmem:[#allocation5 + $0x48] sm:$0xff] }
  0x24   :  { %81 = vmatprep.subr.mxu0 %v64_v9  ;;  %980 = vmatpush3.msra.mxu1 %v163_v19  ;;  %v49_v30 = vld [vmem:[#allocation5 + $0x40] sm:$0xff]  ;;  %v159_v31 = vld [vmem:[#allocation5 + $0x190] sm:$0xff]  ;;  %v48_v32 = vld [vmem:[#allocation5 + $0x38] sm:$0xff] }
  0x25   :  { %82 = vmatpush1.msra.mxu0 %v63_v10  ;;  %981 = vmatprep.subr.mxu1 %v1239_v0  ;;  %v47_v33 = vld [vmem:[#allocation5 + $0x30] sm:$0xff]  ;;  %v158_v34 = vld [vmem:[#allocation5 + $0x180] sm:$0xff]  ;;  %v46_v35 = vld [vmem:[#allocation5 + $0x28] sm:$0xff] }
  0x26   :  { %83 = vmatprep.subr.mxu0 %v62_v11  ;;  %982 = vmatpush3.msra.mxu1 %v162_v22  ;;  %v45_v36 = vld [vmem:[#allocation5 + $0x20] sm:$0xff]  ;;  %v157_v37 = vld [vmem:[#allocation5 + $0x170] sm:$0xff]  ;;  %v44_v38 = vld [vmem:[#allocation5 + $0x18] sm:$0xff] }
  0x27   :  { %84 = vmatpush1.msra.mxu0 %v61_v12  ;;  %983 = vmatprep.subr.mxu1 %v1239_v0  ;;  %v43_v39 = vld [vmem:[#allocation5 + $0x10] sm:$0xff]  ;;  %v156_v40 = vld [vmem:[#allocation5 + $0x160] sm:$0xff]  ;;  %v42_v41 = vld [vmem:[#allocation5 + $0x8] sm:$0xff] }
  0x28   :  { %85 = vmatprep.subr.mxu0 %v60_v13  ;;  %984 = vmatpush3.msra.mxu1 %v161_v25  ;;  %v41_v42 = vld [vmem:[#allocation5] sm:$0xff]  ;;  %v155_v43 = vld [vmem:[#allocation5 + $0x150] sm:$0xff]  ;;  %v1274_v44 = vld [vmem:[#allocation2] sm:$0xff] }
  0x29   :  { %86 = vmatpush1.msra.mxu0 %v59_v14  ;;  %985 = vmatprep.subr.mxu1 %v1239_v0  ;;  %v154_v45 = vld [vmem:[#allocation5 + $0x140] sm:$0xff]  ;;  %v153_v46 = vld [vmem:[#allocation5 + $0x130] sm:$0xff] }
  0x2a   :  { %87 = vmatprep.subr.mxu0 %v58_v17  ;;  %986 = vmatpush3.msra.mxu1 %v160_v28  ;;  %v152_v47 = vld [vmem:[#allocation5 + $0x120] sm:$0xff]  ;;  %v151_v48 = vld [vmem:[#allocation5 + $0x110] sm:$0xff] }
  0x2b   :  { %88 = vmatpush1.msra.mxu0 %v57_v18  ;;  %987 = vmatprep.subr.mxu1 %v1239_v0  ;;  %v150_v49 = vld [vmem:[#allocation5 + $0x100] sm:$0xff]  ;;  %v256_v50 = vld [vmem:[#allocation5 + $0x2f0] sm:$0xff] }
  0x2c   :  { %89 = vmatprep.subr.mxu0 %v56_v20  ;;  %988 = vmatpush3.msra.mxu1 %v159_v31  ;;  %v255_v51 = vld [vmem:[#allocation5 + $0x2e0] sm:$0xff]  ;;  %v254_v52 = vld [vmem:[#allocation5 + $0x2d0] sm:$0xff] }
  0x2d   :  { %90 = vmatpush1.msra.mxu0 %v55_v21  ;;  %989 = vmatprep.subr.mxu1 %v1239_v0  ;;  %v253_v53 = vld [vmem:[#allocation5 + $0x2c0] sm:$0xff]  ;;  %v252_v54 = vld [vmem:[#allocation5 + $0x2b0] sm:$0xff] }
  0x2e   :  { %91 = vmatprep.subr.mxu0 %v54_v23  ;;  %990 = vmatpush3.msra.mxu1 %v158_v34  ;;  %v251_v55 = vld [vmem:[#allocation5 + $0x2a0] sm:$0xff]  ;;  %v250_v56 = vld [vmem:[#allocation5 + $0x290] sm:$0xff] }
  0x2f   :  { %92 = vmatpush1.msra.mxu0 %v53_v24  ;;  %991 = vmatprep.subr.mxu1 %v1239_v0  ;;  %v249_v57 = vld [vmem:[#allocation5 + $0x280] sm:$0xff]  ;;  %v248_v58 = vld [vmem:[#allocation5 + $0x270] sm:$0xff]  ;;  %v168_v24 = vsub.s32 1, %v1303_v1 }
  0x30   :  { %93 = vmatprep.subr.mxu0 %v52_v26  ;;  %992 = vmatpush3.msra.mxu1 %v157_v37  ;;  %v247_v59 = vld [vmem:[#allocation5 + $0x260] sm:$0xff]  ;;  %v246_v60 = vld [vmem:[#allocation5 + $0x250] sm:$0xff]  ;;  %v449_v37 = vld [vmem:[#allocation5 + $0x4d8] sm:$0xff] }
  0x31   :  { %94 = vmatpush1.msra.mxu0 %v51_v27  ;;  %993 = vmatprep.subr.mxu1 %v1239_v0  ;;  %v245_v61 = vld [vmem:[#allocation5 + $0x240] sm:$0xff]  ;;  %v244_v62 = vld [vmem:[#allocation5 + $0x230] sm:$0xff] }
  0x32   :  { %95 = vmatprep.subr.mxu0 %v50_v29  ;;  %994 = vmatpush3.msra.mxu1 %v156_v40  ;;  %v1306_v3 = vld [vmem:[#allocation5 + $0x800] sm:$0xff]  ;;  %v242_v9 = vld [vmem:[#allocation5 + $0x210] sm:$0xff] }
  0x33   :  { %96 = vmatpush1.msra.mxu0 %v49_v30  ;;  %995 = vmatprep.subr.mxu1 %v1239_v0  ;;  %v147_v4 = vrot.slane %v1306_v3, %v146_v2  ;;  %v243_v8 = vld [vmem:[#allocation5 + $0x220] sm:$0xff]  ;;  %v347_v11 = vld [vmem:[#allocation5 + $0x3f0] sm:$0xff]  ;;  %v169_v25 = vrot.slane %v1306_v3, %v168_v24  ;;  %v259_v2 = vsub.s32 2, %v1303_v1 }
  0x34   :  { %97 = vmatprep.subr.mxu0 %v48_v32  ;;  %996 = vmatpush3.msra.mxu1 %v155_v43  ;;  %v241_v10 = vld [vmem:[#allocation5 + $0x200] sm:$0xff]  ;;  %v345_v13 = vld [vmem:[#allocation5 + $0x3d0] sm:$0xff]  ;;  %v443_v43 = vld [vmem:[#allocation5 + $0x4a8] sm:$0xff] }
  0x35   :  { %98 = vmatpush1.msra.mxu0 %v47_v33  ;;  %997 = vmatprep.subr.mxu1 %v1239_v0  ;;  %v346_v12 = vld [vmem:[#allocation5 + $0x3e0] sm:$0xff]  ;;  %v343_v15 = vld [vmem:[#allocation5 + $0x3b0] sm:$0xff]  ;;  %v453_v33 = vld [vmem:[#allocation5 + $0x4f8] sm:$0xff] }
  0x36   :  { %99 = vmatprep.subr.mxu0 %v46_v35  ;;  %998 = vmatpush3.msra.mxu1 %v154_v45  ;;  %v344_v14 = vld [vmem:[#allocation5 + $0x3c0] sm:$0xff]  ;;  %v341_v17 = vld [vmem:[#allocation5 + $0x390] sm:$0xff]  ;;  %v451_v35 = vld [vmem:[#allocation5 + $0x4e8] sm:$0xff] }
  0x37   :  { %100 = vmatpush1.msra.mxu0 %v45_v36  ;;  %999 = vmatprep.subr.mxu1 %v1239_v0  ;;  %v342_v16 = vld [vmem:[#allocation5 + $0x3a0] sm:$0xff]  ;;  %v339_v19 = vld [vmem:[#allocation5 + $0x370] sm:$0xff] }
  0x38   :  { %101 = vmatprep.subr.mxu0 %v44_v38  ;;  %1000 = vmatpush3.msra.mxu1 %v153_v46  ;;  %v340_v18 = vld [vmem:[#allocation5 + $0x380] sm:$0xff]  ;;  %v337_v21 = vld [vmem:[#allocation5 + $0x350] sm:$0xff]  ;;  %v441_v46 = vld [vmem:[#allocation5 + $0x498] sm:$0xff] }
  0x39   :  { %102 = vmatpush1.msra.mxu0 %v43_v39  ;;  %1001 = vmatprep.subr.mxu1 %v1239_v0  ;;  %v338_v20 = vld [vmem:[#allocation5 + $0x360] sm:$0xff]  ;;  %v335_v23 = vld [vmem:[#allocation5 + $0x330] sm:$0xff]  ;;  %v447_v39 = vld [vmem:[#allocation5 + $0x4c8] sm:$0xff] }
  0x3a   :  { %103 = vmatprep.subr.mxu0 %v42_v41  ;;  %1002 = vmatpush3.msra.mxu1 %v152_v47  ;;  %v336_v22 = vld [vmem:[#allocation5 + $0x340] sm:$0xff]  ;;  %v333_v31 = vld [vmem:[#allocation5 + $0x310] sm:$0xff]  ;;  %v445_v41 = vld [vmem:[#allocation5 + $0x4b8] sm:$0xff] }
  0x3b   :  { %104 = vmatpush1.msra.mxu0 %v41_v42  ;;  %1003 = vmatprep.subr.mxu1 %v1239_v0  ;;  %v334_v30 = vld [vmem:[#allocation5 + $0x320] sm:$0xff]  ;;  %v452_v34 = vld [vmem:[#allocation5 + $0x4f0] sm:$0xff] }
  0x3c   :  { %138 = vmatmul.mubr.f32.vlgmr.msra.gmra.mxu0 %v1274_v44  ;;  %1010 = vmatprep.subr.mxu0 %v1239_v0  ;;  %v332_v32 = vld [vmem:[#allocation5 + $0x300] sm:$0xff]  ;;  %v448_v38 = vld [vmem:[#allocation5 + $0x4d0] sm:$0xff] }
  0x3d   :  { %1004 = vmatpush3.msra.mxu1 %v151_v48  ;;  %1042 = vmatprep.mubr.msk.f32.mxu0 %vm1240_vm0, %v1239_v0  ;;  %v450_v36 = vld [vmem:[#allocation5 + $0x4e0] sm:$0xff]  ;;  %v444_v42 = vld [vmem:[#allocation5 + $0x4b0] sm:$0xff]  ;;  %v439_v48 = vld [vmem:[#allocation5 + $0x488] sm:$0xff] }
  0x3e   :  { %1005 = vmatprep.subr.mxu1 %v1239_v0  ;;  %1011 = vmatpush3.msra.mxu0 %v256_v50  ;;  %v446_v40 = vld [vmem:[#allocation5 + $0x4c0] sm:$0xff]  ;;  %v440_v47 = vld [vmem:[#allocation5 + $0x490] sm:$0xff]  ;;  %v437_v50 = vld [vmem:[#allocation5 + $0x478] sm:$0xff] }
  0x3f   :  { %1006 = vmatpush3.msra.mxu1 %v150_v49  ;;  %1012 = vmatprep.subr.mxu0 %v1239_v0  ;;  %v442_v45 = vld [vmem:[#allocation5 + $0x4a0] sm:$0xff] }
  0x40   :  { %1045 = vmatprep.subr.mxu1 %v1239_v0  ;;  %1013 = vmatpush3.msra.mxu0 %v255_v51  ;;  %v438_v49 = vld [vmem:[#allocation5 + $0x480] sm:$0xff]  ;;  %v436_v51 = vld [vmem:[#allocation5 + $0x470] sm:$0xff] }
  0x41   :  { %1014 = vmatprep.subr.mxu0 %v1239_v0  ;;  %v530_v24 = vld [vmem:[#allocation5 + $0x540] sm:$0xff] }
  0x42   :  { %1015 = vmatpush3.msra.mxu0 %v254_v52  ;;  %v435_v52 = vld [vmem:[#allocation5 + $0x468] sm:$0xff] }
  0x43   :  { %1016 = vmatprep.subr.mxu0 %v1239_v0 }
  0x44   :  { %1017 = vmatpush3.msra.mxu0 %v253_v53  ;;  %v434_v53 = vld [vmem:[#allocation5 + $0x460] sm:$0xff] }
  0x45   :  { %1018 = vmatprep.subr.mxu0 %v1239_v0 }
  0x46   :  { %1019 = vmatpush3.msra.mxu0 %v252_v54  ;;  %v433_v54 = vld [vmem:[#allocation5 + $0x458] sm:$0xff] }
  0x47   :  { %1020 = vmatprep.subr.mxu0 %v1239_v0 }
  0x48   :  { %1021 = vmatpush3.msra.mxu0 %v251_v55  ;;  %v432_v55 = vld [vmem:[#allocation5 + $0x450] sm:$0xff] }
  0x49   :  { %1022 = vmatprep.subr.mxu0 %v1239_v0 }
  0x4a   :  { %1023 = vmatpush3.msra.mxu0 %v250_v56  ;;  %v431_v56 = vld [vmem:[#allocation5 + $0x448] sm:$0xff] }
  0x4b   :  { %1024 = vmatprep.subr.mxu0 %v1239_v0 }
  0x4c   :  { %1025 = vmatpush3.msra.mxu0 %v249_v57  ;;  %v430_v57 = vld [vmem:[#allocation5 + $0x440] sm:$0xff] }
  0x4d   :  { %1026 = vmatprep.subr.mxu0 %v1239_v0 }
  0x4e   :  { %1027 = vmatpush3.msra.mxu0 %v248_v58  ;;  %v429_v58 = vld [vmem:[#allocation5 + $0x438] sm:$0xff] }
  0x4f   :  { %1028 = vmatprep.subr.mxu0 %v1239_v0 }
  0x50   :  { %1029 = vmatpush3.msra.mxu0 %v247_v59  ;;  %v428_v59 = vld [vmem:[#allocation5 + $0x430] sm:$0xff] }
  0x51   :  { %1030 = vmatprep.subr.mxu0 %v1239_v0 }
  0x52   :  { %1031 = vmatpush3.msra.mxu0 %v246_v60  ;;  %v427_v60 = vld [vmem:[#allocation5 + $0x428] sm:$0xff] }
  0x53   :  { %1032 = vmatprep.subr.mxu0 %v1239_v0 }
  0x54   :  { %1033 = vmatpush3.msra.mxu0 %v245_v61  ;;  %v426_v61 = vld [vmem:[#allocation5 + $0x420] sm:$0xff] }
  0x55   :  { %1034 = vmatprep.subr.mxu0 %v1239_v0 }
  0x56   :  { %1035 = vmatpush3.msra.mxu0 %v244_v62  ;;  %v425_v62 = vld [vmem:[#allocation5 + $0x418] sm:$0xff] }
  0x57   :  { %1036 = vmatprep.subr.mxu0 %v1239_v0 }
  0x58   :  { %1037 = vmatpush3.msra.mxu0 %v243_v8 }
  0x59   :  { %1038 = vmatprep.subr.mxu0 %v1239_v0 }
  0x5a   :  { %1039 = vmatpush3.msra.mxu0 %v242_v9 }
  0x5b   :  { %1040 = vmatprep.subr.mxu0 %v1239_v0 }
  0x5c   :  { %1041 = vmatpush3.msra.mxu0 %v241_v10  ;;  %v424_v10 = vld [vmem:[#allocation5 + $0x410] sm:$0xff] }
  0x5d   :  { %454 = vmatprep.subr.mxu0 %v453_v33  ;;  %v526_v33 = vld [vmem:[#allocation5 + $0x500] sm:$0xff] }
  0xfc   :  { %v139_v5 = vpop.f32.mrf.mxu0 }
  0xfd   :  { %v148_v6 = vadd.f32 %v147_v4, %v139_v5  ;;  %v260_v4 = vrot.slane %v1306_v3, %v259_v2  ;;  %v741_v2 = vld [vmem:[#allocation5 + $0x7d8] sm:$0xff] }
  0xfe   :  { %v1334_v5 = vpop.f32.mrf.mxu0 }
  0xff   :  { %v149_v7 = vmax.f32 %v148_v6, 0.0 }
 0x101   :  { %1008 = vmatmul.mubr.f32.vlgmr.msra.gmra.mxu1 %v149_v7 }
 0x102   :  { %1077 = vmatprep.mubr.msk.f32.mxu1 %vm1240_vm0, %v1239_v0  ;;  %1046 = vmatpush3.msra.mxu1 %v347_v11  ;;  %v423_v11 = vld [vmem:[#allocation5 + $0x408] sm:$0xff] }
 0x103   :  { %1047 = vmatprep.subr.mxu1 %v1239_v0 }
 0x104   :  { %1048 = vmatpush3.msra.mxu1 %v346_v12  ;;  %v422_v12 = vld [vmem:[#allocation5 + $0x400] sm:$0xff] }
 0x105   :  { %1049 = vmatprep.subr.mxu1 %v1239_v0 }
 0x106   :  { %1050 = vmatpush3.msra.mxu1 %v345_v13  ;;  %v541_v13 = vld [vmem:[#allocation5 + $0x5f0] sm:$0xff] }
 0x107   :  { %1051 = vmatprep.subr.mxu1 %v1239_v0 }
 0x108   :  { %1052 = vmatpush3.msra.mxu1 %v344_v14  ;;  %v540_v14 = vld [vmem:[#allocation5 + $0x5e0] sm:$0xff] }
 0x109   :  { %1053 = vmatprep.subr.mxu1 %v1239_v0 }
 0x10a   :  { %1054 = vmatpush3.msra.mxu1 %v343_v15  ;;  %v539_v15 = vld [vmem:[#allocation5 + $0x5d0] sm:$0xff] }
 0x10b   :  { %1055 = vmatprep.subr.mxu1 %v1239_v0 }
 0x10c   :  { %1056 = vmatpush3.msra.mxu1 %v342_v16  ;;  %v538_v16 = vld [vmem:[#allocation5 + $0x5c0] sm:$0xff] }
 0x10d   :  { %1057 = vmatprep.subr.mxu1 %v1239_v0 }
 0x10e   :  { %1058 = vmatpush3.msra.mxu1 %v341_v17  ;;  %v537_v17 = vld [vmem:[#allocation5 + $0x5b0] sm:$0xff] }
 0x10f   :  { %1059 = vmatprep.subr.mxu1 %v1239_v0 }
 0x110   :  { %1060 = vmatpush3.msra.mxu1 %v340_v18  ;;  %v536_v18 = vld [vmem:[#allocation5 + $0x5a0] sm:$0xff] }
 0x111   :  { %1061 = vmatprep.subr.mxu1 %v1239_v0 }
 0x112   :  { %1062 = vmatpush3.msra.mxu1 %v339_v19  ;;  %v535_v19 = vld [vmem:[#allocation5 + $0x590] sm:$0xff] }
 0x113   :  { %1063 = vmatprep.subr.mxu1 %v1239_v0 }
 0x114   :  { %1064 = vmatpush3.msra.mxu1 %v338_v20  ;;  %v534_v20 = vld [vmem:[#allocation5 + $0x580] sm:$0xff] }
 0x115   :  { %1065 = vmatprep.subr.mxu1 %v1239_v0 }
 0x116   :  { %1066 = vmatpush3.msra.mxu1 %v337_v21  ;;  %v533_v21 = vld [vmem:[#allocation5 + $0x570] sm:$0xff] }
 0x117   :  { %1067 = vmatprep.subr.mxu1 %v1239_v0 }
 0x118   :  { %1068 = vmatpush3.msra.mxu1 %v336_v22  ;;  %v532_v22 = vld [vmem:[#allocation5 + $0x560] sm:$0xff] }
 0x119   :  { %1069 = vmatprep.subr.mxu1 %v1239_v0 }
 0x11a   :  { %1070 = vmatpush3.msra.mxu1 %v335_v23  ;;  %v531_v23 = vld [vmem:[#allocation5 + $0x550] sm:$0xff] }
 0x11b   :  { %1071 = vmatprep.subr.mxu1 %v1239_v0 }
 0x11c   :  { %1072 = vmatpush3.msra.mxu1 %v334_v30 }
 0x11d   :  { %1073 = vmatprep.subr.mxu1 %v1239_v0 }
 0x11e   :  { %1074 = vmatpush3.msra.mxu1 %v333_v31 }
 0x11f   :  { %1075 = vmatprep.subr.mxu1 %v1239_v0 }
 0x120   :  { %1076 = vmatpush3.msra.mxu1 %v332_v32  ;;  %v527_v32 = vld [vmem:[#allocation5 + $0x510] sm:$0xff] }
 0x121   :  { %1080 = vmatprep.subr.mxu1 %v1239_v0 }
 0x1c1   :  { %v236_v26 = vpop.f32.mrf.mxu1 }
 0x1c2   :  { %v237_v27 = vadd.f32 %v236_v26, %v169_v25  ;;  %v529_v25 = vld [vmem:[#allocation5 + $0x530] sm:$0xff]  ;;  %v528_v26 = vld [vmem:[#allocation5 + $0x520] sm:$0xff] }
 0x1c3   :  { %v1009_v28 = vpop.f32.mrf.mxu1 }
 0x1c4   :  { %v240_v29 = vmax.f32 %v237_v27, 0.0  ;;  %v350_v27 = vsub.s32 3, %v1303_v1 }
 0x1c6   :  { %1043 = vmatmul.mubr.f32.vlgmr.msra.gmra.mxu0 %v240_v29  ;;  %v351_v28 = vrot.slane %v1306_v3, %v350_v27 }
 0x1c7   :  { %518 = vmatprep.mubr.f32.mxu0 %v1239_v0  ;;  %455 = vmatpush1.msra.mxu0 %v452_v34 }
 0x1c8   :  { %456 = vmatprep.subr.mxu0 %v451_v35 }
 0x1c9   :  { %457 = vmatpush1.msra.mxu0 %v450_v36 }
 0x1ca   :  { %458 = vmatprep.subr.mxu0 %v449_v37 }
 0x1cb   :  { %459 = vmatpush1.msra.mxu0 %v448_v38  ;;  %v638_v38 = vld [vmem:[#allocation5 + $0x6f0] sm:$0xff] }
 0x1cc   :  { %460 = vmatprep.subr.mxu0 %v447_v39  ;;  %v637_v39 = vld [vmem:[#allocation5 + $0x6e0] sm:$0xff] }
 0x1cd   :  { %461 = vmatpush1.msra.mxu0 %v446_v40  ;;  %v636_v40 = vld [vmem:[#allocation5 + $0x6d0] sm:$0xff] }
 0x1ce   :  { %462 = vmatprep.subr.mxu0 %v445_v41  ;;  %v635_v41 = vld [vmem:[#allocation5 + $0x6c0] sm:$0xff] }
 0x1cf   :  { %463 = vmatpush1.msra.mxu0 %v444_v42  ;;  %v634_v42 = vld [vmem:[#allocation5 + $0x6b0] sm:$0xff] }
 0x1d0   :  { %464 = vmatprep.subr.mxu0 %v443_v43  ;;  %v633_v43 = vld [vmem:[#allocation5 + $0x6a0] sm:$0xff] }
 0x1d1   :  { %465 = vmatpush1.msra.mxu0 %v442_v45 }
 0x1d2   :  { %466 = vmatprep.subr.mxu0 %v441_v46 }
 0x1d3   :  { %467 = vmatpush1.msra.mxu0 %v440_v47 }
 0x1d4   :  { %468 = vmatprep.subr.mxu0 %v439_v48 }
 0x1d5   :  { %469 = vmatpush1.msra.mxu0 %v438_v49  ;;  %v632_v49 = vld [vmem:[#allocation5 + $0x690] sm:$0xff] }
 0x1d6   :  { %470 = vmatprep.subr.mxu0 %v437_v50  ;;  %v631_v50 = vld [vmem:[#allocation5 + $0x680] sm:$0xff] }
 0x1d7   :  { %471 = vmatpush1.msra.mxu0 %v436_v51  ;;  %v630_v51 = vld [vmem:[#allocation5 + $0x670] sm:$0xff] }
 0x1d8   :  { %472 = vmatprep.subr.mxu0 %v435_v52  ;;  %v629_v52 = vld [vmem:[#allocation5 + $0x660] sm:$0xff] }
 0x1d9   :  { %473 = vmatpush1.msra.mxu0 %v434_v53  ;;  %v628_v53 = vld [vmem:[#allocation5 + $0x650] sm:$0xff] }
 0x1da   :  { %474 = vmatprep.subr.mxu0 %v433_v54  ;;  %v627_v54 = vld [vmem:[#allocation5 + $0x640] sm:$0xff] }
 0x1db   :  { %475 = vmatpush1.msra.mxu0 %v432_v55  ;;  %v626_v55 = vld [vmem:[#allocation5 + $0x630] sm:$0xff] }
 0x1dc   :  { %476 = vmatprep.subr.mxu0 %v431_v56  ;;  %v625_v56 = vld [vmem:[#allocation5 + $0x620] sm:$0xff] }
 0x1dd   :  { %477 = vmatpush1.msra.mxu0 %v430_v57  ;;  %v624_v57 = vld [vmem:[#allocation5 + $0x610] sm:$0xff] }
 0x1de   :  { %478 = vmatprep.subr.mxu0 %v429_v58  ;;  %v623_v58 = vld [vmem:[#allocation5 + $0x600] sm:$0xff] }
 0x1df   :  { %479 = vmatpush1.msra.mxu0 %v428_v59  ;;  %v745_v59 = vld [vmem:[#allocation5 + $0x7f8] sm:$0xff] }
 0x1e0   :  { %480 = vmatprep.subr.mxu0 %v427_v60  ;;  %v744_v60 = vld [vmem:[#allocation5 + $0x7f0] sm:$0xff] }
 0x1e1   :  { %481 = vmatpush1.msra.mxu0 %v426_v61  ;;  %v743_v61 = vld [vmem:[#allocation5 + $0x7e8] sm:$0xff] }
 0x1e2   :  { %482 = vmatprep.subr.mxu0 %v425_v62  ;;  %v742_v62 = vld [vmem:[#allocation5 + $0x7e0] sm:$0xff] }
 0x1e3   :  { %483 = vmatpush1.msra.mxu0 %v424_v10  ;;  %v734_v10 = vld [vmem:[#allocation5 + $0x7a0] sm:$0xff] }
 0x1e4   :  { %484 = vmatprep.subr.mxu0 %v423_v11  ;;  %v733_v11 = vld [vmem:[#allocation5 + $0x798] sm:$0xff] }
 0x1e5   :  { %485 = vmatpush1.msra.mxu0 %v422_v12  ;;  %v732_v12 = vld [vmem:[#allocation5 + $0x790] sm:$0xff] }
 0x1e6   :  { %1115 = vmatprep.subr.mxu0 %v1239_v0 }
 0x286   :  { %v327_v6 = vpop.f32.mrf.mxu0 }
 0x287   :  { %v328_v7 = vadd.f32 %v327_v6, %v260_v4  ;;  %v740_v4 = vld [vmem:[#allocation5 + $0x7d0] sm:$0xff]  ;;  %v738_v6 = vld [vmem:[#allocation5 + $0x7c0] sm:$0xff] }
 0x288   :  { %v1044_v8 = vpop.f32.mrf.mxu0 }
 0x289   :  { %v331_v9 = vmax.f32 %v328_v7, 0.0  ;;  %v737_v7 = vld [vmem:[#allocation5 + $0x7b8] sm:$0xff]  ;;  %v736_v8 = vld [vmem:[#allocation5 + $0x7b0] sm:$0xff] }
 0x28b   :  { %1078 = vmatmul.mubr.f32.vlgmr.msra.gmra.mxu1 %v331_v9  ;;  %v735_v9 = vld [vmem:[#allocation5 + $0x7a8] sm:$0xff] }
 0x28c   :  { %1112 = vmatprep.mubr.msk.f32.mxu1 %vm1240_vm0, %v1239_v0  ;;  %1081 = vmatpush3.msra.mxu1 %v541_v13  ;;  %v731_v13 = vld [vmem:[#allocation5 + $0x788] sm:$0xff] }
 0x28d   :  { %1082 = vmatprep.subr.mxu1 %v1239_v0 }
 0x28e   :  { %1083 = vmatpush3.msra.mxu1 %v540_v14  ;;  %v730_v14 = vld [vmem:[#allocation5 + $0x780] sm:$0xff] }
 0x28f   :  { %1084 = vmatprep.subr.mxu1 %v1239_v0 }
 0x290   :  { %1085 = vmatpush3.msra.mxu1 %v539_v15  ;;  %v729_v15 = vld [vmem:[#allocation5 + $0x778] sm:$0xff] }
 0x291   :  { %1086 = vmatprep.subr.mxu1 %v1239_v0 }
 0x292   :  { %1087 = vmatpush3.msra.mxu1 %v538_v16  ;;  %v728_v16 = vld [vmem:[#allocation5 + $0x770] sm:$0xff] }
 0x293   :  { %1088 = vmatprep.subr.mxu1 %v1239_v0 }
 0x294   :  { %1089 = vmatpush3.msra.mxu1 %v537_v17  ;;  %v727_v17 = vld [vmem:[#allocation5 + $0x768] sm:$0xff] }
 0x295   :  { %1090 = vmatprep.subr.mxu1 %v1239_v0 }
 0x296   :  { %1091 = vmatpush3.msra.mxu1 %v536_v18  ;;  %v726_v18 = vld [vmem:[#allocation5 + $0x760] sm:$0xff] }
 0x297   :  { %1092 = vmatprep.subr.mxu1 %v1239_v0 }
 0x298   :  { %1093 = vmatpush3.msra.mxu1 %v535_v19  ;;  %v725_v19 = vld [vmem:[#allocation5 + $0x758] sm:$0xff] }
 0x299   :  { %1094 = vmatprep.subr.mxu1 %v1239_v0 }
 0x29a   :  { %1095 = vmatpush3.msra.mxu1 %v534_v20  ;;  %v724_v20 = vld [vmem:[#allocation5 + $0x750] sm:$0xff] }
 0x29b   :  { %1096 = vmatprep.subr.mxu1 %v1239_v0 }
 0x29c   :  { %1097 = vmatpush3.msra.mxu1 %v533_v21  ;;  %v723_v21 = vld [vmem:[#allocation5 + $0x748] sm:$0xff] }
 0x29d   :  { %1098 = vmatprep.subr.mxu1 %v1239_v0 }
 0x29e   :  { %1099 = vmatpush3.msra.mxu1 %v532_v22  ;;  %v722_v22 = vld [vmem:[#allocation5 + $0x740] sm:$0xff] }
 0x29f   :  { %1100 = vmatprep.subr.mxu1 %v1239_v0 }
 0x2a0   :  { %1101 = vmatpush3.msra.mxu1 %v531_v23  ;;  %v721_v23 = vld [vmem:[#allocation5 + $0x738] sm:$0xff] }
 0x2a1   :  { %1102 = vmatprep.subr.mxu1 %v1239_v0 }
 0x2a2   :  { %1103 = vmatpush3.msra.mxu1 %v530_v24  ;;  %v720_v24 = vld [vmem:[#allocation5 + $0x730] sm:$0xff] }
 0x2a3   :  { %1104 = vmatprep.subr.mxu1 %v1239_v0 }
 0x2a4   :  { %1105 = vmatpush3.msra.mxu1 %v529_v25  ;;  %v719_v25 = vld [vmem:[#allocation5 + $0x728] sm:$0xff] }
 0x2a5   :  { %1106 = vmatprep.subr.mxu1 %v1239_v0 }
 0x2a6   :  { %1107 = vmatpush3.msra.mxu1 %v528_v26 }
 0x2a7   :  { %1108 = vmatprep.subr.mxu1 %v1239_v0 }
 0x2a8   :  { %1109 = vmatpush3.msra.mxu1 %v527_v32  ;;  %v718_v32 = vld [vmem:[#allocation5 + $0x720] sm:$0xff] }
 0x2a9   :  { %1110 = vmatprep.subr.mxu1 %v1239_v0 }
 0x2aa   :  { %1111 = vmatpush3.msra.mxu1 %v526_v33  ;;  %v717_v33 = vld [vmem:[#allocation5 + $0x718] sm:$0xff] }
 0x2ab   :  { %746 = vmatprep.subr.mxu1 %v745_v59 }
 0x34b   :  { %v418_v29 = vpop.f32.mrf.mxu1 }
 0x34c   :  { %v419_v30 = vadd.f32 %v418_v29, %v351_v28 }
 0x34d   :  { %v1079_v31 = vpop.f32.mrf.mxu1 }
 0x34e   :  { %519 = vmatmul.mubr.f32.vlgmr.msra.gmra.mxu0 %v419_v30 }
 0x34f   :  { %1147 = vmatprep.mubr.msk.f32.mxu0 %vm1240_vm0, %v1239_v0  ;;  %1116 = vmatpush3.msra.mxu0 %v638_v38 }
 0x350   :  { %1117 = vmatprep.subr.mxu0 %v1239_v0 }
 0x351   :  { %1118 = vmatpush3.msra.mxu0 %v637_v39 }
 0x352   :  { %1119 = vmatprep.subr.mxu0 %v1239_v0 }
 0x353   :  { %1120 = vmatpush3.msra.mxu0 %v636_v40 }
 0x354   :  { %1121 = vmatprep.subr.mxu0 %v1239_v0 }
 0x355   :  { %1122 = vmatpush3.msra.mxu0 %v635_v41 }
 0x356   :  { %1123 = vmatprep.subr.mxu0 %v1239_v0 }
 0x357   :  { %1124 = vmatpush3.msra.mxu0 %v634_v42 }
 0x358   :  { %1125 = vmatprep.subr.mxu0 %v1239_v0 }
 0x359   :  { %1126 = vmatpush3.msra.mxu0 %v633_v43  ;;  %v40_v43 = vld [vmem:[#allocation5 + $0x808] sm:$0xff] }
 0x35a   :  { %1127 = vmatprep.subr.mxu0 %v1239_v0 }
 0x35b   :  { %1128 = vmatpush3.msra.mxu0 %v632_v49 }
 0x35c   :  { %1129 = vmatprep.subr.mxu0 %v1239_v0 }
 0x35d   :  { %1130 = vmatpush3.msra.mxu0 %v631_v50 }
 0x35e   :  { %1131 = vmatprep.subr.mxu0 %v1239_v0 }
 0x35f   :  { %1132 = vmatpush3.msra.mxu0 %v630_v51 }
 0x360   :  { %1133 = vmatprep.subr.mxu0 %v1239_v0 }
 0x361   :  { %1134 = vmatpush3.msra.mxu0 %v629_v52 }
 0x362   :  { %1135 = vmatprep.subr.mxu0 %v1239_v0 }
 0x363   :  { %1136 = vmatpush3.msra.mxu0 %v628_v53  ;;  %v832_v53 = vand.u32 127, %v144_v63 }
 0x364   :  { %1137 = vmatprep.subr.mxu0 %v1239_v0 }
 0x365   :  { %1138 = vmatpush3.msra.mxu0 %v627_v54  ;;  %vm833_vm1 = vcmp.lt.s32.totalorder %v832_v53, 6  ;;  %vm866_vm3 = vcmp.eq.s32.totalorder %v832_v53, 6  ;;  %vm869_vm4 = vcmp.eq.s32.totalorder %v832_v53, 7 }
 0x366   :  { %1139 = vmatprep.subr.mxu0 %v1239_v0 }
 0x367   :  { %1140 = vmatpush3.msra.mxu0 %v626_v55 }
 0x368   :  { %1141 = vmatprep.subr.mxu0 %v1239_v0 }
 0x369   :  { %1142 = vmatpush3.msra.mxu0 %v625_v56  ;;  %v834_v56 = vsel %vm833_vm1, %v1274_v44, 0.0 }
 0x36a   :  { %1143 = vmatprep.subr.mxu0 %v1239_v0  ;;  %v839_v63 = vmul.f32 -0.5, %v834_v56 }
 0x36b   :  { %1144 = vmatpush3.msra.mxu0 %v624_v57 }
 0x36c   :  { %1145 = vmatprep.subr.mxu0 %v1239_v0 }
 0x36d   :  { %1146 = vmatpush3.msra.mxu0 %v623_v58 }
 0x40e   :  { %v520_v34 = vpop.f32.mrf.mxu0 }
 0x40f   :  { %v525_v35 = vmul.f32 %v520_v34, %v1334_v5  ;;  %v739_v5 = vld [vmem:[#allocation5 + $0x7c8] sm:$0xff]  ;;  %v716_v34 = vld [vmem:[#allocation5 + $0x710] sm:$0xff] }
 0x410   :  { %v522_v30 = vpop.f32.mrf.mxu0 }
 0x411   :  { %1113 = vmatmul.mubr.f32.vlgmr.msra.gmra.mxu1 %v525_v35  ;;  %v715_v35 = vld [vmem:[#allocation5 + $0x708] sm:$0xff] }
 0x412   :  { %810 = vmatprep.mubr.f32.mxu1 %v1239_v0  ;;  %747 = vmatpush1.msra.mxu1 %v744_v60 }
 0x413   :  { %748 = vmatprep.subr.mxu1 %v743_v61 }
 0x414   :  { %749 = vmatpush1.msra.mxu1 %v742_v62 }
 0x415   :  { %750 = vmatprep.subr.mxu1 %v741_v2 }
 0x416   :  { %751 = vmatpush1.msra.mxu1 %v740_v4 }
 0x417   :  { %752 = vmatprep.subr.mxu1 %v739_v5 }
 0x418   :  { %753 = vmatpush1.msra.mxu1 %v738_v6 }
 0x419   :  { %754 = vmatprep.subr.mxu1 %v737_v7 }
 0x41a   :  { %755 = vmatpush1.msra.mxu1 %v736_v8  ;;  %v840_v8 = vmul.f32 %v839_v63, %v834_v56 }
 0x41b   :  { %756 = vmatprep.subr.mxu1 %v735_v9 }
 0x41c   :  { %757 = vmatpush1.msra.mxu1 %v734_v10 }
 0x41d   :  { %758 = vmatprep.subr.mxu1 %v733_v11 }
 0x41e   :  { %759 = vmatpush1.msra.mxu1 %v732_v12 }
 0x41f   :  { %760 = vmatprep.subr.mxu1 %v731_v13 }
 0x420   :  { %761 = vmatpush1.msra.mxu1 %v730_v14 }
 0x421   :  { %762 = vmatprep.subr.mxu1 %v729_v15 }
 0x422   :  { %763 = vmatpush1.msra.mxu1 %v728_v16 }
 0x423   :  { %764 = vmatprep.subr.mxu1 %v727_v17 }
 0x424   :  { %765 = vmatpush1.msra.mxu1 %v726_v18 }
 0x425   :  { %766 = vmatprep.subr.mxu1 %v725_v19 }
 0x426   :  { %767 = vmatpush1.msra.mxu1 %v724_v20 }
 0x427   :  { %768 = vmatprep.subr.mxu1 %v723_v21 }
 0x428   :  { %769 = vmatpush1.msra.mxu1 %v722_v22 }
 0x429   :  { %770 = vmatprep.subr.mxu1 %v721_v23  ;;  %v870_v23 = vsel %vm869_vm4, -0.00250001, %v1239_v0 }
 0x42a   :  { %771 = vmatpush1.msra.mxu1 %v720_v24 }
 0x42b   :  { %772 = vmatprep.subr.mxu1 %v719_v25 }
 0x42c   :  { %773 = vmatpush1.msra.mxu1 %v718_v32 }
 0x42d   :  { %774 = vmatprep.subr.mxu1 %v717_v33 }
 0x42e   :  { %775 = vmatpush1.msra.mxu1 %v716_v34 }
 0x42f   :  { %776 = vmatprep.subr.mxu1 %v715_v35 }
 0x4d1   :  { %v608_v36 = vpop.f32.mrf.mxu1 }
 0x4d2   :  { %612 = vmax.xlane.f32.xlu0 %v608_v36 }
 0x4d3   :  { %v1114_v37 = vpop.f32.mrf.mxu1 }
 0x4d4   :  { %v641_v37 = vsub.s32 4, %v1303_v1 }
 0x4d6   :  { %v642_v38 = vrot.slane %v1306_v3, %v641_v37 }
 0x55b   :  { %v613_v45 = vpop.xlane.xlu0 %612 }
 0x55c   :  { %v614_v46 = vsub.f32 %v608_v36, %v613_v45  ;;  %v714_v36 = vld [vmem:[#allocation5 + $0x700] sm:$0xff]  ;;  %v819_v45 = vsub.s32 5, %v1303_v1 }
 0x55d   :  { %777 = vmatpush1.msra.mxu1 %v714_v36 }
 0x55e   :  { %v615_v47 = vmul.f32 1.442695, %v614_v46  ;;  %v825_v46 = vrot.slane %v40_v43, %v819_v45  ;;  %v820_v54 = vrot.slane %v1306_v3, %v819_v45 }
 0x560   :  { %1157 = vpow2.f32 %v615_v47 }
 0x56d   :  { %v1366_v48 = vpop.eup %1157 }
 0x56e   :  { %617 = vadd.xlane.f32.xlu0 %v1366_v48 }
 0x5f7   :  { %v618_v26 = vpop.xlane.xlu0 %617 }
 0x5f8   :  { %1159 = vrcp.f32 %v618_v26 }
 0x605   :  { %v1160_v27 = vpop.eup %1159 }
 0x606   :  { %v620_v28 = vmul.f32 32.0, %v1160_v27 }
 0x608   :  { %v621_v29 = vmul.f32 %v1366_v48, %v620_v28 }
 0x60a   :  { %v622_v31 = vmul.f32 %v621_v29, %v522_v30 }
 0x60c   :  { %1148 = vmatmul.mubr.f32.vlgmr.msra.gmra.mxu0 %v622_v31 }
 0x6cc   :  { %v709_v39 = vpop.f32.mrf.mxu0 }
 0x6cd   :  { %v710_v40 = vadd.f32 %v709_v39, %v642_v38 }
 0x6ce   :  { %v1149_v41 = vpop.f32.mrf.mxu0 }
 0x6cf   :  { %v713_v42 = vmax.f32 %v710_v40, 0.0 }
 0x6d1   :  { %811 = vmatmul.mubr.f32.vlgmr.msra.gmra.mxu1 %v713_v42 }
 0x791   :  { %v812_v47 = vpop.f32.mrf.mxu1 }
 0x792   :  { %v821_v57 = vadd.f32 %v820_v54, %v812_v47 }
 0x793   :  { %v814_v48 = vpop.f32.mrf.mxu1 }
 0x794   :  { %v826_v49 = vadd.f32 %v825_v46, %v814_v48 }
 0x796   :  { %v827_v50 = vmax.f32 %v826_v49, -20.0 }
 0x798   :  { %v828_v51 = vmin.f32 %v827_v50, 2.0 }
 0x79a   :  { %v829_v52 = vmul.f32 1.442695, %v828_v51  ;;  %v841_v12 = vsub.f32 %v840_v8, %v828_v51 }
 0x79c   :  { %1161 = vpow2.f32 %v829_v52  ;;  %v889_v16 = vadd.f32 -0.9189385, %v841_v12 }
 0x7a9   :  { %v1162_v55 = vpop.eup %1161 }
 0x7aa   :  { %v835_v58 = vmul.f32 %v1162_v55, %v834_v56 }
 0x7ac   :  { %v836_v1 = vadd.f32 %v835_v58, %v821_v57 }
 0x7ae   :  { %v844_v59 = vmul.f32 -2.0, %v836_v1  ;;  %v843_v13 = vsub.f32 0.6931472, %v836_v1 }
 0x7b0   :  { %v846_v60 = vand.u32 2147483647, %v844_v59  ;;  %v845_v44 = vmax.f32 %v844_v59, 0.0 }
 0x7b2   :  { %v847_v61 = vsub.f32 0.0, %v846_v60 }
 0x7b4   :  { %v848_v62 = vmul.f32 1.442695, %v847_v61 }
 0x7b6   :  { %1163 = vpow2.f32 %v848_v62 }
 0x7c3   :  { %v1164_v2 = vpop.eup %1163 }
 0x7c4   :  { %v850_v4 = vadd.f32 1.0, %v1164_v2  ;;  %v853_v5 = vmul.f32 -0.5, %v1164_v2  ;;  %v856_v3 = vand.u32 2147483647, %v1164_v2 }
 0x7c6   :  { %1165 = vlog2.f32 %v850_v4  ;;  %v854_v6 = vadd.f32 1.0, %v853_v5  ;;  %vm857_vm2 = vcmp.lt.f32.partialorder %v856_v3, 0.0004427343 }
 0x7c7   :  { %1167 = vtanh.f32 %v836_v1 }
 0x7c8   :  { %v855_v10 = vmul.f32 %v1164_v2, %v854_v6 }
 0x7d3   :  { %v1166_v7 = vpop.eup %1165 }
 0x7d4   :  { %v852_v9 = vmul.f32 0.6931472, %v1166_v7  ;;  %v1168_v20 = vpop.eup %1167 }
 0x7d5   :  { %v838_v22 = vmul.f32 2.0, %v1168_v20 }
 0x7d6   :  { %v858_v11 = vsel %vm857_vm2, %v855_v10, %v852_v9 }
 0x7d7   :  { %v859_v14 = vadd.f32 %v858_v11, %v845_v44 }
 0x7d9   :  { %v860_v15 = vsub.f32 %v843_v13, %v859_v14 }
 0x7db   :  { %v861_v17 = vmul.f32 2.0, %v860_v15 }
 0x7dd   :  { %v862_v18 = vsub.f32 %v889_v16, %v861_v17 }
 0x7df   :  { %v863_v19 = vsel %vm833_vm1, %v862_v18, 0.0 }
 0x7e0   :  { %864 = vadd.xlane.f32.xlu1 %v863_v19 }
 0x869   :  { %v865_v21 = vpop.xlane.xlu1 %864 }
 0x86a   :  { %v867_v24 = vsel %vm866_vm3, %v865_v21, 0.0 }
 0x86b   :  { %v868_v25 = vadd.f32 %v867_v24, %v838_v22 }
 0x86d   :  { %v871_v26 = vadd.f32 %v870_v23, %v868_v25 }
 0x86f   :  { %872 = vst [vmem:[#allocation7] sm:$0xff] %v871_v26 }
 0x870   :  { %1220 = shalt.err (!%p1217_p0)
}
 0x871   :  { %882 = dma.vmem_to_hbm [thread:$0]  %s880_s1, 128, %s1393_s2, [#allocation4]  }
 0x872   :  { %1233 = dma.done.wait [#allocation4], 128  }
 0x873   :  { %1234 = vsyncadd [#allocation4], 4294967168 }
 0x874   :  { %886 = vsyncpa [#allocation3], 1 }
 0x875   :  { %887 = vsyncpa [#allocation6], 1 }
 0x876   :  { %888 = vsyncpa [#allocation4], 1 }

</bundles_post_ra>
